<compile_context>
chip_gen: v6e
topology: v6e:2x2x1
jax: 0.10.0
libtpu: 0.0.40
codegen_flags: <defaults>
</compile_context>

<pallas_src>
import functools
import math

import jax
import jax.numpy as jnp
from jax.experimental import pallas as pl
from jax.experimental.pallas import tpu as pltpu

ALPHA = 0.25
GAMMA = 2.0          # focal exponent; explicit square fast path below
DICE_WEIGHT = 0.3
SMOOTH = 1.0

_LANES = 128
_MAX_BLOCK_ROWS = 8192          # (8192,128) f32 = 4 MiB per pipeline buffer
_SUB_ROWS = 1024                # in-kernel compute chunk (bounds temporaries)
_VMEM_LIMIT_BYTES = 48 * 1024 * 1024   # explicit: covers 16 MiB buffers + chunk temps


@functools.lru_cache(maxsize=None)
def _num_tensorcores():
    """Best-effort TensorCores-per-chip (2 on v7x, 1 on v5e/v6e).

    Falls back to 1 whenever the information is unavailable so single-core
    chips never pay for a duplicated / masked core split.
    """
    try:
        info = pltpu.get_tpu_info()
    except Exception:
        return 1
    for name in ("num_cores", "num_tensorcores", "tensorcore_count", "cores_per_chip"):
        n = getattr(info, name, None)
        if isinstance(n, int) and n == 2:
            return 2
    return 1


def _elementwise_terms(x, t):
    """Per-element Focal/Dice terms sharing the transcendental work (~4 EUP ops/elem)."""
    e = jnp.exp(-jnp.abs(x))                        # exp(-|x|)
    denom_inv = 1.0 / (1.0 + e)                     # shared by sigmoid and pt
    probs = jnp.where(x >= 0, 1.0, e) * denom_inv   # sigmoid(x)

    xt = x * t
    mx = jnp.maximum(x, 0.0)
    bce = mx - xt + jnp.log1p(e)                    # stable BCE-with-logits
    pt = jnp.exp(xt - mx) * denom_inv               # == exp(-bce), exact for soft targets
    one_m_pt = 1.0 - pt
    if GAMMA == 2.0:
        focal_w = one_m_pt * one_m_pt               # fast path, no float pow
    else:
        focal_w = jnp.power(one_m_pt, jnp.float32(GAMMA))
    focal = (ALPHA * bce) * focal_w
    return probs * t, probs + t, focal


def _combo_kernel(x_ref, t_ref, out_ref,
                  acc_pt_ref, acc_sum_ref, acc_focal_ref,
                  *, rows_valid, block_rows, sub_rows, tiles_per_core,
                  num_full_tiles, num_grid_tiles, two_d_grid):
    if two_d_grid:
        c = pl.program_id(0)                 # CORE_PARALLEL axis (v7x)
        j = pl.program_id(1)                 # sequential reduction axis
        tile_idx = c * tiles_per_core + j
        last_j = pl.num_programs(1) - 1
    else:
        j = pl.program_id(0)
        tile_idx = j
        last_j = pl.num_programs(0) - 1

    @pl.when(j == 0)
    def _init():
        acc_pt_ref[...] = jnp.zeros_like(acc_pt_ref)
        acc_sum_ref[...] = jnp.zeros_like(acc_sum_ref)
        acc_focal_ref[...] = jnp.zeros_like(acc_focal_ref)

    def accumulate(pt_term, sum_term, focal, nrows):
        # Accumulate into (8,128) vector accumulators: pure VPU adds per chunk.
        if nrows % 8 == 0:
            g = nrows // 8
            acc_pt_ref[...] += jnp.sum(pt_term.reshape(g, 8, _LANES), axis=0)
            acc_sum_ref[...] += jnp.sum(sum_term.reshape(g, 8, _LANES), axis=0)
            acc_focal_ref[...] += jnp.sum(focal.reshape(g, 8, _LANES), axis=0)
        else:
            acc_pt_ref[0:1, :] += jnp.sum(pt_term, axis=0, keepdims=True)
            acc_sum_ref[0:1, :] += jnp.sum(sum_term, axis=0, keepdims=True)
            acc_focal_ref[0:1, :] += jnp.sum(focal, axis=0, keepdims=True)

    def process_chunk(start_row, nrows, masked):
        x = x_ref[pl.ds(start_row, nrows), :].astype(jnp.float32)
        t = t_ref[pl.ds(start_row, nrows), :].astype(jnp.float32)
        pt_term, sum_term, focal = _elementwise_terms(x, t)
        if masked:
            # Rows beyond rows_valid come from Pallas edge-block padding (or a
            # clamped duplicate tile); zero them with a cheap (nrows,1) row mask
            # that jnp.where broadcasts across the 128 lanes.
            valid_rows = rows_valid - tile_idx * block_rows - start_row
            row_i = jax.lax.broadcasted_iota(jnp.int32, (nrows, 1), 0)
            keep = row_i < valid_rows
            zero = jnp.float32(0.0)
            pt_term = jnp.where(keep, pt_term, zero)
            sum_term = jnp.where(keep, sum_term, zero)
            focal = jnp.where(keep, focal, zero)
        accumulate(pt_term, sum_term, focal, nrows)

    n_full_sub = block_rows // sub_rows
    rem_rows = block_rows - n_full_sub * sub_rows

    def process_tile(masked):
        if n_full_sub == 1:
            process_chunk(0, sub_rows, masked)
        elif n_full_sub > 1:
            @pl.loop(0, n_full_sub)
            def _(s):
                process_chunk(pl.multiple_of(s * sub_rows, 8), sub_rows, masked)
        if rem_rows:
            process_chunk(n_full_sub * sub_rows, rem_rows, masked)

    if num_full_tiles == num_grid_tiles:
        # Every grid step covers a fully-valid tile: no masking anywhere.
        process_tile(masked=False)
    else:
        is_full = tile_idx < num_full_tiles

        @pl.when(is_full)
        def _lean():
            process_tile(masked=False)

        @pl.when(jnp.logical_not(is_full))
        def _edge():
            process_tile(masked=True)

    @pl.when(j == last_j)
    def _finalize():
        out_ref[0, 0, :, :] = acc_pt_ref[...]
        out_ref[0, 1, :, :] = acc_sum_ref[...]
        out_ref[0, 2, :, :] = acc_focal_ref[...]


def _tail_sums(x, t):
    # Plain-JAX contribution of a <128-element ragged tail (keeps the kernel
    # free of lane masking and avoids a padded full-array HBM copy).
    x = x.astype(jnp.float32)
    t = t.astype(jnp.float32)
    probs = jax.nn.sigmoid(x)
    bce = jnp.maximum(x, 0.0) - x * t + jnp.log1p(jnp.exp(-jnp.abs(x)))
    pt = jnp.exp(-bce)
    if GAMMA == 2.0:
        fw = (1.0 - pt) * (1.0 - pt)
    else:
        fw = (1.0 - pt) ** GAMMA
    focal = ALPHA * fw * bce
    return jnp.stack([jnp.sum(probs * t), jnp.sum(probs + t), jnp.sum(focal)])


@jax.jit
def combo_loss(inputs, targets):
    assert inputs.shape == targets.shape, (inputs.shape, targets.shape)
    total_n = math.prod(inputs.shape)
    assert 0 < total_n < 2 ** 31   # row indexing stays well inside int32

    x = inputs.reshape(total_n)
    t = targets.reshape(total_n)

    rows_valid = total_n // _LANES
    main_n = rows_valid * _LANES
    tail_n = total_n - main_n

    sums = jnp.zeros((3,), jnp.float32)
    if tail_n:
        sums = sums + _tail_sums(x[main_n:], t[main_n:])

    if rows_valid > 0:
        # Free metadata reshape when total_n % 128 == 0 (common case);
        # otherwise only the main part is sliced once.
        x2d = x[:main_n].reshape(rows_valid, _LANES)
        t2d = t[:main_n].reshape(rows_valid, _LANES)

        if rows_valid <= _MAX_BLOCK_ROWS:
            block_rows = rows_valid          # full-extent block: always legal, no masking
        else:
            block_rows = _MAX_BLOCK_ROWS     # multiple of 32: fine for f32/bf16/int8 tiles
        sub_rows = min(_SUB_ROWS, block_rows)
        num_tiles = -(-rows_valid // block_rows)
        num_full_tiles = rows_valid // block_rows

        ncores = _num_tensorcores()
        if ncores > 1 and num_tiles >= 2 * ncores:
            two_d = True
            tiles_per_core = -(-num_tiles // ncores)
            num_grid_tiles = ncores * tiles_per_core
            grid = (ncores, tiles_per_core)
            dims = (pltpu.CORE_PARALLEL, pltpu.ARBITRARY)
            needs_clamp = num_grid_tiles != num_tiles

            def in_map(c, j):
                idx = c * tiles_per_core + j
                if needs_clamp:
                    # Uneven split: clamp to the last valid tile; the in-kernel
                    # row mask zeroes the duplicated contribution.
                    idx = jnp.minimum(idx, num_tiles - 1)
                return (idx, 0)

            out_map = lambda c, j: (c, 0, 0, 0)
        else:
            two_d = False
            ncores = 1
            tiles_per_core = num_tiles
            num_grid_tiles = num_tiles
            grid = (num_tiles,)
            dims = (pltpu.ARBITRARY,)
            in_map = lambda j: (j, 0)
            out_map = lambda j: (0, 0, 0, 0)

        kernel = functools.partial(
            _combo_kernel,
            rows_valid=rows_valid,
            block_rows=block_rows,
            sub_rows=sub_rows,
            tiles_per_core=tiles_per_core,
            num_full_tiles=num_full_tiles,
            num_grid_tiles=num_grid_tiles,
            two_d_grid=two_d,
        )

        partials = pl.pallas_call(
            kernel,
            out_shape=jax.ShapeDtypeStruct((ncores, 3, 8, _LANES), jnp.float32),
            grid_spec=pltpu.PrefetchScalarGridSpec(
                num_scalar_prefetch=0,
                grid=grid,
                in_specs=[
                    pl.BlockSpec((block_rows, _LANES), in_map),
                    pl.BlockSpec((block_rows, _LANES), in_map),
                ],
                out_specs=pl.BlockSpec((1, 3, 8, _LANES), out_map),
                scratch_shapes=[pltpu.VMEM((8, _LANES), jnp.float32)] * 3,
            ),
            compiler_params=pltpu.CompilerParams(
                dimension_semantics=dims,
                vmem_limit_bytes=_VMEM_LIMIT_BYTES,
            ),
        )(x2d, t2d)

        sums = sums + jnp.sum(partials, axis=(0, 2, 3))

    intersection, union, focal_sum = sums[0], sums[1], sums[2]
    dice = 1.0 - (2.0 * intersection + SMOOTH) / (union + SMOOTH)
    focal_mean = focal_sum / jnp.float32(total_n)
    return (1.0 - DICE_WEIGHT) * focal_mean + DICE_WEIGHT * dice


def _reference(inputs, targets):
    x = inputs.astype(jnp.float32)
    t = targets.astype(jnp.float32)
    probs = jax.nn.sigmoid(x)
    dice = 1.0 - (2.0 * jnp.sum(probs * t) + SMOOTH) / (jnp.sum(probs + t) + SMOOTH)
    bce = jnp.maximum(x, 0.0) - x * t + jnp.log1p(jnp.exp(-jnp.abs(x)))
    pt = jnp.exp(-bce)
    focal = jnp.mean(ALPHA * (1.0 - pt) ** GAMMA * bce)
    return (1.0 - DICE_WEIGHT) * focal + DICE_WEIGHT * dice


if __name__ == "__main__":
    key = jax.random.PRNGKey(0)
    k1, k2 = jax.random.split(key)
    # NCHW, batch=2, channels=4, spatial=16x16  -> 2048 elements
    inputs = jax.random.normal(k1, (2, 4, 16, 16), dtype=jnp.float32)
    targets = (jax.random.uniform(k2, (2, 4, 16, 16)) > 0.5).astype(jnp.float32)

    loss = combo_loss(inputs, targets)
    jax.block_until_ready(loss)

    ref = _reference(inputs, targets)
    assert jnp.allclose(loss, ref, rtol=1e-5, atol=1e-5), (loss, ref)
    print("KERNEL_OK")
</pallas_src>

<mosaic_0001>
module attributes {stable_mosaic.version = 11 : i64} {
  func.func @_combo_kernel(%arg0: i32, %arg1: memref<16x128xf32, #tpu.memory_space<vmem>>, %arg2: memref<16x128xf32, #tpu.memory_space<vmem>>, %arg3: memref<1x3x8x128xf32, #tpu.memory_space<vmem>>, %arg4: memref<8x128xf32, #tpu.memory_space<vmem>>, %arg5: memref<8x128xf32, #tpu.memory_space<vmem>>, %arg6: memref<8x128xf32, #tpu.memory_space<vmem>>) attributes {dimension_semantics = [#tpu.dimension_semantics<arbitrary>], iteration_bounds = array<i64: 1>, scalar_prefetch = 0 : i64, scratch_operands = 3 : i64, tpu.core_type = #tpu.core_type<tc>, window_params = [{transform_indices = @transform_0, window_bounds = array<i64: 16, 128>}, {transform_indices = @transform_1, window_bounds = array<i64: 16, 128>}, {pipeline_mode = #tpu.pipeline_mode<synchronous>, transform_indices = @transform_2, window_bounds = array<i64: 1, 3, 8, 128>}]} {
    %c0_i32 = arith.constant 0 : i32
    %0 = arith.cmpi eq, %arg0, %c0_i32 : i32
    %1 = arith.extui %0 : i1 to i32
    %c0_i32_0 = arith.constant 0 : i32
    %2 = arith.cmpi ne, %1, %c0_i32_0 : i32
    scf.if %2 {
      %cst_28 = arith.constant 0.000000e+00 : f32
      %53 = vector.broadcast %cst_28 : f32 to vector<8x128xf32>
      %c0_29 = arith.constant 0 : index
      %c0_30 = arith.constant 0 : index
      %54 = vector.load %arg4[%c0_29, %c0_30] : memref<8x128xf32, #tpu.memory_space<vmem>>, vector<8x128xf32>
      tpu.vector_store %arg4[%c0_29, %c0_30], %53 {strides = array<i32>} : memref<8x128xf32, #tpu.memory_space<vmem>>, vector<8x128xf32>,
      %cst_31 = arith.constant 0.000000e+00 : f32
      %55 = vector.broadcast %cst_31 : f32 to vector<8x128xf32>
      %c0_32 = arith.constant 0 : index
      %c0_33 = arith.constant 0 : index
      %56 = vector.load %arg5[%c0_32, %c0_33] : memref<8x128xf32, #tpu.memory_space<vmem>>, vector<8x128xf32>
      tpu.vector_store %arg5[%c0_32, %c0_33], %55 {strides = array<i32>} : memref<8x128xf32, #tpu.memory_space<vmem>>, vector<8x128xf32>,
      %cst_34 = arith.constant 0.000000e+00 : f32
      %57 = vector.broadcast %cst_34 : f32 to vector<8x128xf32>
      %c0_35 = arith.constant 0 : index
      %c0_36 = arith.constant 0 : index
      %58 = vector.load %arg6[%c0_35, %c0_36] : memref<8x128xf32, #tpu.memory_space<vmem>>, vector<8x128xf32>
      tpu.vector_store %arg6[%c0_35, %c0_36], %57 {strides = array<i32>} : memref<8x128xf32, #tpu.memory_space<vmem>>, vector<8x128xf32>,
    } else {
    }
    %c0 = arith.constant 0 : index
    %c0_1 = arith.constant 0 : index
    %3 = vector.load %arg1[%c0, %c0_1] : memref<16x128xf32, #tpu.memory_space<vmem>>, vector<16x128xf32>
    %c0_2 = arith.constant 0 : index
    %c0_3 = arith.constant 0 : index
    %4 = vector.load %arg2[%c0_2, %c0_3] : memref<16x128xf32, #tpu.memory_space<vmem>>, vector<16x128xf32>
    %5 = math.absf %3 : vector<16x128xf32>
    %cst = arith.constant 0.000000e+00 : f32
    %6 = vector.broadcast %cst : f32 to vector<16x128xf32>
    %7 = arith.subf %6, %5 : vector<16x128xf32>
    %8 = math.exp %7 : vector<16x128xf32>
    %cst_4 = arith.constant 1.000000e+00 : f32
    %9 = vector.broadcast %cst_4 : f32 to vector<16x128xf32>
    %10 = arith.addf %9, %8 : vector<16x128xf32>
    %cst_5 = arith.constant 1.000000e+00 : f32
    %11 = vector.broadcast %cst_5 : f32 to vector<16x128xf32>
    %12 = arith.divf %11, %10 : vector<16x128xf32>
    %cst_6 = arith.constant 0.000000e+00 : f32
    %13 = vector.broadcast %cst_6 : f32 to vector<16x128xf32>
    %14 = arith.cmpf oge, %3, %13 : vector<16x128xf32>
    %cst_7 = arith.constant 1.000000e+00 : f32
    %15 = vector.broadcast %cst_7 : f32 to vector<16x128xf32>
    %16 = arith.select %14, %15, %8 : vector<16x128xi1>, vector<16x128xf32>
    %17 = arith.mulf %16, %12 : vector<16x128xf32>
    %18 = arith.mulf %3, %4 : vector<16x128xf32>
    %cst_8 = arith.constant 0.000000e+00 : f32
    %19 = vector.broadcast %cst_8 : f32 to vector<16x128xf32>
    %20 = arith.maximumf %3, %19 : vector<16x128xf32>
    %21 = arith.subf %20, %18 : vector<16x128xf32>
    %22 = math.log1p %8 : vector<16x128xf32>
    %23 = arith.addf %21, %22 : vector<16x128xf32>
    %24 = arith.subf %18, %20 : vector<16x128xf32>
    %25 = math.exp %24 : vector<16x128xf32>
    %26 = arith.mulf %25, %12 : vector<16x128xf32>
    %cst_9 = arith.constant 1.000000e+00 : f32
    %27 = vector.broadcast %cst_9 : f32 to vector<16x128xf32>
    %28 = arith.subf %27, %26 : vector<16x128xf32>
    %29 = arith.mulf %28, %28 : vector<16x128xf32>
    %cst_10 = arith.constant 2.500000e-01 : f32
    %30 = vector.broadcast %cst_10 : f32 to vector<16x128xf32>
    %31 = arith.mulf %30, %23 : vector<16x128xf32>
    %32 = arith.mulf %31, %29 : vector<16x128xf32>
    %33 = arith.mulf %17, %4 : vector<16x128xf32>
    %34 = arith.addf %17, %4 : vector<16x128xf32>
    %c0_11 = arith.constant 0 : index
    %c0_12 = arith.constant 0 : index
    %35 = vector.load %arg4[%c0_11, %c0_12] : memref<8x128xf32, #tpu.memory_space<vmem>>, vector<8x128xf32>
    %36 = vector.shape_cast %33 : vector<16x128xf32> to vector<2x8x128xf32>
    %cst_13 = arith.constant dense<0.000000e+00> : vector<8x128xf32>
    %37 = vector.multi_reduction <add>, %36, %cst_13 [0] : vector<2x8x128xf32> to vector<8x128xf32>
    %38 = arith.addf %35, %37 : vector<8x128xf32>
    %c0_14 = arith.constant 0 : index
    %c0_15 = arith.constant 0 : index
    %39 = vector.load %arg4[%c0_14, %c0_15] : memref<8x128xf32, #tpu.memory_space<vmem>>, vector<8x128xf32>
    tpu.vector_store %arg4[%c0_14, %c0_15], %38 {strides = array<i32>} : memref<8x128xf32, #tpu.memory_space<vmem>>, vector<8x128xf32>,
    %c0_16 = arith.constant 0 : index
    %c0_17 = arith.constant 0 : index
    %40 = vector.load %arg5[%c0_16, %c0_17] : memref<8x128xf32, #tpu.memory_space<vmem>>, vector<8x128xf32>
    %41 = vector.shape_cast %34 : vector<16x128xf32> to vector<2x8x128xf32>
    %cst_18 = arith.constant dense<0.000000e+00> : vector<8x128xf32>
    %42 = vector.multi_reduction <add>, %41, %cst_18 [0] : vector<2x8x128xf32> to vector<8x128xf32>
    %43 = arith.addf %40, %42 : vector<8x128xf32>
    %c0_19 = arith.constant 0 : index
    %c0_20 = arith.constant 0 : index
    %44 = vector.load %arg5[%c0_19, %c0_20] : memref<8x128xf32, #tpu.memory_space<vmem>>, vector<8x128xf32>
    tpu.vector_store %arg5[%c0_19, %c0_20], %43 {strides = array<i32>} : memref<8x128xf32, #tpu.memory_space<vmem>>, vector<8x128xf32>,
    %c0_21 = arith.constant 0 : index
    %c0_22 = arith.constant 0 : index
    %45 = vector.load %arg6[%c0_21, %c0_22] : memref<8x128xf32, #tpu.memory_space<vmem>>, vector<8x128xf32>
    %46 = vector.shape_cast %32 : vector<16x128xf32> to vector<2x8x128xf32>
    %cst_23 = arith.constant dense<0.000000e+00> : vector<8x128xf32>
    %47 = vector.multi_reduction <add>, %46, %cst_23 [0] : vector<2x8x128xf32> to vector<8x128xf32>
    %48 = arith.addf %45, %47 : vector<8x128xf32>
    %c0_24 = arith.constant 0 : index
    %c0_25 = arith.constant 0 : index
    %49 = vector.load %arg6[%c0_24, %c0_25] : memref<8x128xf32, #tpu.memory_space<vmem>>, vector<8x128xf32>
    tpu.vector_store %arg6[%c0_24, %c0_25], %48 {strides = array<i32>} : memref<8x128xf32, #tpu.memory_space<vmem>>, vector<8x128xf32>,
    %c0_i32_26 = arith.constant 0 : i32
    %50 = arith.cmpi eq, %arg0, %c0_i32_26 : i32
    %51 = arith.extui %50 : i1 to i32
    %c0_i32_27 = arith.constant 0 : i32
    %52 = arith.cmpi ne, %51, %c0_i32_27 : i32
    scf.if %52 {
      %c0_28 = arith.constant 0 : index
      %c0_29 = arith.constant 0 : index
      %53 = vector.load %arg4[%c0_28, %c0_29] : memref<8x128xf32, #tpu.memory_space<vmem>>, vector<8x128xf32>
      %c0_30 = arith.constant 0 : index
      %c0_31 = arith.constant 0 : index
      %c0_32 = arith.constant 0 : index
      %c0_33 = arith.constant 0 : index
      %54 = vector.load %arg3[%c0_30, %c0_31, %c0_32, %c0_33] : memref<1x3x8x128xf32, #tpu.memory_space<vmem>>, vector<1x1x8x128xf32>
      %55 = vector.shape_cast %54 : vector<1x1x8x128xf32> to vector<8x128xf32>
      %56 = vector.shape_cast %53 : vector<8x128xf32> to vector<1x1x8x128xf32>
      tpu.vector_store %arg3[%c0_30, %c0_31, %c0_32, %c0_33], %56 {strides = array<i32>} : memref<1x3x8x128xf32, #tpu.memory_space<vmem>>, vector<1x1x8x128xf32>,
      %c0_34 = arith.constant 0 : index
      %c0_35 = arith.constant 0 : index
      %57 = vector.load %arg5[%c0_34, %c0_35] : memref<8x128xf32, #tpu.memory_space<vmem>>, vector<8x128xf32>
      %c0_36 = arith.constant 0 : index
      %c1 = arith.constant 1 : index
      %c0_37 = arith.constant 0 : index
      %c0_38 = arith.constant 0 : index
      %58 = vector.load %arg3[%c0_36, %c1, %c0_37, %c0_38] : memref<1x3x8x128xf32, #tpu.memory_space<vmem>>, vector<1x1x8x128xf32>
      %59 = vector.shape_cast %58 : vector<1x1x8x128xf32> to vector<8x128xf32>
      %60 = vector.shape_cast %57 : vector<8x128xf32> to vector<1x1x8x128xf32>
      tpu.vector_store %arg3[%c0_36, %c1, %c0_37, %c0_38], %60 {strides = array<i32>} : memref<1x3x8x128xf32, #tpu.memory_space<vmem>>, vector<1x1x8x128xf32>,
      %c0_39 = arith.constant 0 : index
      %c0_40 = arith.constant 0 : index
      %61 = vector.load %arg6[%c0_39, %c0_40] : memref<8x128xf32, #tpu.memory_space<vmem>>, vector<8x128xf32>
      %c0_41 = arith.constant 0 : index
      %c2 = arith.constant 2 : index
      %c0_42 = arith.constant 0 : index
      %c0_43 = arith.constant 0 : index
      %62 = vector.load %arg3[%c0_41, %c2, %c0_42, %c0_43] : memref<1x3x8x128xf32, #tpu.memory_space<vmem>>, vector<1x1x8x128xf32>
      %63 = vector.shape_cast %62 : vector<1x1x8x128xf32> to vector<8x128xf32>
      %64 = vector.shape_cast %61 : vector<8x128xf32> to vector<1x1x8x128xf32>
      tpu.vector_store %arg3[%c0_41, %c2, %c0_42, %c0_43], %64 {strides = array<i32>} : memref<1x3x8x128xf32, #tpu.memory_space<vmem>>, vector<1x1x8x128xf32>,
    } else {
    }
    return
  }
  func.func @transform_0(%arg0: i32) -> (i32, i32) {
    %c0_i32 = arith.constant 0 : i32
    %c0_i32_0 = arith.constant 0 : i32
    return %arg0, %c0_i32 : i32, i32
  }
  func.func @transform_1(%arg0: i32) -> (i32, i32) {
    %c0_i32 = arith.constant 0 : i32
    %c0_i32_0 = arith.constant 0 : i32
    return %arg0, %c0_i32 : i32, i32
  }
  func.func @transform_2(%arg0: i32) -> (i32, i32, i32, i32) {
    %c0_i32 = arith.constant 0 : i32
    %c0_i32_0 = arith.constant 0 : i32
    %c0_i32_1 = arith.constant 0 : i32
    %c0_i32_2 = arith.constant 0 : i32
    %c0_i32_3 = arith.constant 0 : i32
    return %c0_i32, %c0_i32_0, %c0_i32_1, %c0_i32_2 : i32, i32, i32, i32
  }
}

</mosaic_0001>

<bundles_post_ra>
// kernel: combo_loss.1
= control target key start
LH: loop header
LB: loop body
LE: loop exit
PB: predicated region body
PF: predicated region fallthrough
CT: control target
= control target key end

     0   :  { %s181_s0 = inlined_call_operand.vmem [shape: f32[16,128], index: 0, kind: input, shape index: {}]   ;;  %s182_s1 = inlined_call_operand.vmem [shape: f32[16,128], index: 1, kind: input, shape index: {}]   ;;  %s183_s2 = inlined_call_operand.vmem [shape: f32[1,3,8,128], index: 2, kind: output, shape index: {}]  }
   0x1   :  { %v18_v0 = vld [vmem:[%s181_s0] sm:$0xff]  ;;  %v19_v1 = vld [vmem:[%s181_s0 + $0x8] sm:$0xff] }
   0x2   :  { %v22_v2 = vand.u32 2147483647, %v18_v0  ;;  %v23_v3 = vand.u32 2147483647, %v19_v1  ;;  %v20_v8 = vld [vmem:[%s182_s1] sm:$0xff]  ;;  %v21_v9 = vld [vmem:[%s182_s1 + $0x8] sm:$0xff] }
   0x3   :  { %v42_v10 = vmul.f32 %v20_v8, %v18_v0  ;;  %v44_v11 = vmax.f32 %v18_v0, 0.0  ;;  %v43_v12 = vmul.f32 %v21_v9, %v19_v1  ;;  %v45_v13 = vmax.f32 %v19_v1, 0.0 }
   0x4   :  { %v24_v4 = vsub.f32 0.0, %v22_v2  ;;  %v25_v5 = vsub.f32 0.0, %v23_v3  ;;  %vm36_vm0 = vcmp.ge.f32.partialorder %v18_v0, 0.0  ;;  %vm37_vm1 = vcmp.ge.f32.partialorder %v19_v1, 0.0 }
   0x5   :  { %v68_v14 = vsub.f32 %v42_v10, %v44_v11  ;;  %v69_v15 = vsub.f32 %v43_v12, %v45_v13  ;;  %v46_v33 = vsub.f32 %v44_v11, %v42_v10  ;;  %v47_v34 = vsub.f32 %v45_v13, %v43_v12 }
   0x6   :  { %v26_v6 = vmul.f32 1.442695, %v24_v4  ;;  %v28_v7 = vmul.f32 1.442695, %v25_v5 }
   0x7   :  { %v70_v16 = vmul.f32 1.442695, %v68_v14  ;;  %v72_v17 = vmul.f32 1.442695, %v69_v15 }
   0x8   :  { %117 = vpow2.f32 %v26_v6 }
   0x9   :  { %119 = vpow2.f32 %v28_v7 }
   0xa   :  { %121 = vpow2.f32 %v70_v16 }
   0xb   :  { %123 = vpow2.f32 %v72_v17 }
  0x15   :  { %v118_v18 = vpop.eup %117 }
  0x16   :  { %v120_v19 = vpop.eup %119  ;;  %v30_v20 = vadd.f32 1.0, %v118_v18  ;;  %v51_v22 = vmul.f32 -0.5, %v118_v18  ;;  %v54_v25 = vand.u32 2147483647, %v118_v18  ;;  %v38_v27 = vsel %vm36_vm0, 1.0, %v118_v18 }
  0x17   :  { %v31_v21 = vadd.f32 1.0, %v120_v19  ;;  %v60_v23 = vmul.f32 -0.5, %v120_v19  ;;  %v122_v26 = vpop.eup %121  ;;  %v63_v29 = vand.u32 2147483647, %v120_v19  ;;  %v39_v31 = vsel %vm37_vm1, 1.0, %v120_v19 }
  0x18   :  { %125 = vrcp.f32 %v30_v20  ;;  %v52_v24 = vadd.f32 1.0, %v51_v22  ;;  %v124_v30 = vpop.eup %123  ;;  %vm160_vm2 = vcmp.lt.f32.partialorder %v54_v25, 0.0004427343 }
  0x19   :  { %127 = vrcp.f32 %v31_v21  ;;  %v61_v28 = vadd.f32 1.0, %v60_v23  ;;  %vm164_vm3 = vcmp.lt.f32.partialorder %v63_v29, 0.0004427343 }
  0x1a   :  { %129 = vlog2.f32 %v30_v20  ;;  %v53_v37 = vmul.f32 %v118_v18, %v52_v24 }
  0x1b   :  { %131 = vlog2.f32 %v31_v21  ;;  %v62_v42 = vmul.f32 %v120_v19, %v61_v28 }
  0x25   :  { %v126_v32 = vpop.eup %125 }
  0x26   :  { %v128_v35 = vpop.eup %127  ;;  %v40_v36 = vmul.f32 %v126_v32, %v38_v27  ;;  %v74_v39 = vmul.f32 %v126_v32, %v122_v26 }
  0x27   :  { %v130_v40 = vpop.eup %129  ;;  %v41_v41 = vmul.f32 %v128_v35, %v39_v31  ;;  %v75_v44 = vmul.f32 %v128_v35, %v124_v30 }
  0x28   :  { %v132_v45 = vpop.eup %131  ;;  %v84_v46 = vmul.f32 %v40_v36, %v20_v8  ;;  %v86_v47 = vadd.f32 %v40_v36, %v20_v8  ;;  %v50_v48 = vmul.f32 0.6931472, %v130_v40  ;;  %v76_v49 = vsub.f32 1.0, %v74_v39 }
  0x29   :  { %v85_v50 = vmul.f32 %v41_v41, %v21_v9  ;;  %v87_v51 = vadd.f32 %v41_v41, %v21_v9  ;;  %v59_v52 = vmul.f32 0.6931472, %v132_v45  ;;  %v77_v53 = vsub.f32 1.0, %v75_v44 }
  0x2a   :  { %v56_v54 = vsel %vm160_vm2, %v53_v37, %v50_v48  ;;  %v78_v55 = vmul.f32 %v76_v49, %v76_v49 }
  0x2b   :  { %v89_v56 = vadd.f32 %v85_v50, %v84_v46  ;;  %v93_v57 = vadd.f32 %v87_v51, %v86_v47  ;;  %v65_v58 = vsel %vm164_vm3, %v62_v42, %v59_v52  ;;  %v66_v59 = vadd.f32 %v56_v54, %v46_v33 }
  0x2c   :  { %v67_v60 = vadd.f32 %v65_v58, %v47_v34  ;;  %v79_v61 = vmul.f32 %v77_v53, %v77_v53 }
  0x2d   :  { %104 = vst [vmem:[%s183_s2] sm:$0xff] %v89_v56  ;;  %115 = vst [vmem:[%s183_s2 + $0x8] sm:$0xff] %v93_v57  ;;  %v80_v62 = vmul.f32 0.25, %v66_v59 }
  0x2e   :  { %v81_v63 = vmul.f32 0.25, %v67_v60 }
  0x2f   :  { %v82_v0 = vmul.f32 %v80_v62, %v78_v55 }
  0x30   :  { %v83_v1 = vmul.f32 %v81_v63, %v79_v61 }
  0x32   :  { %v97_v2 = vadd.f32 %v83_v1, %v82_v0 }
  0x34   :  { %116 = vst [vmem:[%s183_s2 + $0x10] sm:$0xff] %v97_v2 }

</bundles_post_ra>
